<compile_context>
chip_gen: v5e
topology: v5e:2x2
jax: 0.10.0
libtpu: 0.0.40
codegen_flags: <defaults>
</compile_context>

<pallas_src>
import jax
import jax.numpy as jnp
from jax import lax
from jax.experimental import pallas as pl
from jax.experimental.pallas import tpu as pltpu


_LANES = 128
_MAX_ROW_TILE = 2048   # (2048, 128) f32 = 1 MiB per block; <= 8 MiB total with
                       # double-buffered in+out -> fits default scoped VMEM on
                       # v5e (16 MiB), v6e (32 MiB) and v7x (32 MiB)


def _round_up(n, m):
    return ((n + m - 1) // m) * m


def _plan_tiling(numel):
    """rows_padded % row_tile == 0, row_tile % 8 == 0, row_tile <= _MAX_ROW_TILE."""
    rows = -(-numel // _LANES)
    row_tile = min(_MAX_ROW_TILE, _round_up(max(rows, 8), 8))
    rows_padded = _round_up(rows, row_tile)
    return rows_padded, row_tile


def _flatten_pad(x, rows_padded, pad_value):
    flat = x.reshape(-1).astype(jnp.float32)
    pad = rows_padded * _LANES - flat.size
    if pad:
        flat = lax.pad(flat, pad_value, [(0, pad, 0)])
    return flat.reshape(rows_padded, _LANES)


# ----------------------------------------------------------------------------
# Kernel 1: per-tensor min/max reduction (ANALYSIS -> update_encoding_stats)
# ----------------------------------------------------------------------------
def tensor_min_max(x):
    numel = x.size
    rows_padded, row_tile = _plan_tiling(numel)
    flat = x.reshape(-1).astype(jnp.float32)
    pad_val = flat[-1]                      # neutral for both min and max
    x2d = _flatten_pad(x, rows_padded, pad_val)

    n_blocks = rows_padded // row_tile
    # 2-way outer split so the reduction can shard across the two v7x TCs
    n_outer = 2 if (n_blocks >= 2 and n_blocks % 2 == 0) else 1
    n_inner = n_blocks // n_outer

    def kernel(x_ref, min_out, max_out, min_acc, max_acc):
        i = pl.program_id(1)

        @pl.when(i == 0)
        def _():
            min_acc[...] = jnp.full(min_acc.shape, jnp.inf, dtype=min_acc.dtype)
            max_acc[...] = jnp.full(max_acc.shape, -jnp.inf, dtype=max_acc.dtype)

        xb = x_ref[...]
        # elementwise VPU updates -> hidden under the HBM DMA
        min_acc[...] = jnp.minimum(min_acc[...], xb)
        max_acc[...] = jnp.maximum(max_acc[...], xb)

        @pl.when(i == pl.num_programs(1) - 1)
        def _():
            # single cross-lane/sublane reduce per outer slice
            min_out[0, 0] = jnp.min(min_acc[...])
            max_out[0, 0] = jnp.max(max_acc[...])

    mn, mx = pl.pallas_call(
        kernel,
        out_shape=(jax.ShapeDtypeStruct((n_outer, 1), jnp.float32),
                   jax.ShapeDtypeStruct((n_outer, 1), jnp.float32)),
        grid_spec=pltpu.PrefetchScalarGridSpec(
            num_scalar_prefetch=0,
            grid=(n_outer, n_inner),
            in_specs=[pl.BlockSpec((row_tile, _LANES),
                                   lambda o, i: (o * n_inner + i, 0))],
            out_specs=(
                pl.BlockSpec((1, 1), lambda o, i: (o, 0),
                             memory_space=pltpu.MemorySpace.SMEM),
                pl.BlockSpec((1, 1), lambda o, i: (o, 0),
                             memory_space=pltpu.MemorySpace.SMEM),
            ),
            scratch_shapes=[pltpu.VMEM((row_tile, _LANES), jnp.float32),
                            pltpu.VMEM((row_tile, _LANES), jnp.float32)],
        ),
        compiler_params=pltpu.CompilerParams(
            dimension_semantics=("parallel", "arbitrary")),
        cost_estimate=pl.CostEstimate(flops=2 * numel, transcendentals=0,
                                      bytes_accessed=4 * numel),
    )(x2d)
    return jnp.min(mn), jnp.max(mx)


# ----------------------------------------------------------------------------
# Kernel 2: quantize-dequantize (ACTIVE -> quantize_dequantize, ROUND_NEAREST)
# ----------------------------------------------------------------------------
def _qdq_kernel(params_ref, x_ref, o_ref):
    # params (SMEM, scalar-prefetched): [inv_delta, delta, qmin, qmax]
    inv_d = params_ref[0]
    d = params_ref[1]
    lo = params_ref[2]
    hi = params_ref[3]
    t = x_ref[...] * inv_d
    # libpymo ROUND_NEAREST == round-half-away-from-zero (C++ std::round)
    q = jnp.where(t >= 0.0, jnp.floor(t + 0.5), jnp.ceil(t - 0.5))
    q = jnp.clip(q, lo, hi)          # offset folded into the clip bounds
    o_ref[...] = (q * d).astype(o_ref.dtype)


def quantize_dequantize(x, delta, offset, num_steps):
    orig_shape = x.shape
    orig_dtype = x.dtype
    numel = x.size
    rows_padded, row_tile = _plan_tiling(numel)
    x2d = _flatten_pad(x, rows_padded, jnp.asarray(0.0, jnp.float32))

    delta = jnp.asarray(delta, jnp.float32)
    inv_delta = 1.0 / delta
    qmin = jnp.asarray(offset, jnp.float32)
    qmax = qmin + jnp.asarray(num_steps, jnp.float32)
    params = jnp.stack([inv_delta, delta, qmin, qmax])

    n_blocks = rows_padded // row_tile
    out2d = pl.pallas_call(
        _qdq_kernel,
        out_shape=jax.ShapeDtypeStruct((rows_padded, _LANES), jnp.float32),
        grid_spec=pltpu.PrefetchScalarGridSpec(
            num_scalar_prefetch=1,
            grid=(n_blocks,),
            in_specs=[pl.BlockSpec((row_tile, _LANES), lambda i, p: (i, 0))],
            out_specs=pl.BlockSpec((row_tile, _LANES), lambda i, p: (i, 0)),
        ),
        compiler_params=pltpu.CompilerParams(
            dimension_semantics=("parallel",)),
        cost_estimate=pl.CostEstimate(flops=6 * numel, transcendentals=0,
                                      bytes_accessed=8 * numel),
    )(params, x2d)

    return out2d.reshape(-1)[:numel].reshape(orig_shape).astype(orig_dtype)


# ----------------------------------------------------------------------------
# Module-level wrapper reproducing QcQuantizeStandAloneBase._quantize_activation
# ----------------------------------------------------------------------------
PASSTHROUGH, ANALYSIS, ACTIVE = 1, 2, 3


class QcQuantizeStandAlonePallas:
    """Pallas port of QcQuantizeStandAloneBase with one StaticGridPerTensor
    output quantizer (post_training_tf scheme, asymmetric, int)."""

    def __init__(self, activation_bw=8, is_symmetric=False):
        self.bitwidth = activation_bw
        self.is_symmetric = is_symmetric   # TODO(synk): symmetric grid / TF-enhanced stats not implemented
        self._mode = ANALYSIS              # default mode, as in the PyTorch module
        # TODO(synk): running stats are host-side mutable attributes; under jit/vmap
        # this differs from the stateful PyTorch quantizer object.
        self.enc_min = jnp.float32(jnp.inf)
        self.enc_max = jnp.float32(-jnp.inf)

    def set_output_bw(self, output_bw):
        self.bitwidth = output_bw

    def set_mode(self, mode):
        self._mode = mode

    def _compute_encoding(self):
        # TF scheme: include zero in the range, asymmetric grid.
        mn = jnp.minimum(self.enc_min, 0.0)
        mx = jnp.maximum(self.enc_max, 0.0)
        mx = jnp.where(mx - mn < 1e-5, mn + 1e-5, mx)
        num_steps = jnp.float32(2 ** self.bitwidth - 1)
        delta = (mx - mn) / num_steps
        offset = jnp.round(mn / delta)
        return delta, offset, num_steps

    def forward(self, x):
        if self._mode == ANALYSIS:
            mn, mx = tensor_min_max(x)                     # Pallas reduction
            self.enc_min = jnp.minimum(self.enc_min, mn)
            self.enc_max = jnp.maximum(self.enc_max, mx)
            return x                                       # passthrough output
        if self._mode == ACTIVE:
            delta, offset, num_steps = self._compute_encoding()
            return quantize_dequantize(x, delta, offset, num_steps)
        return x  # PASSTHROUGH

    __call__ = forward


if __name__ == "__main__":
    key = jax.random.PRNGKey(0)
    x = jax.random.normal(key, (2, 4, 16, 16), dtype=jnp.float32)  # NCHW

    op = QcQuantizeStandAlonePallas(activation_bw=8, is_symmetric=False)

    # ANALYSIS (default): collect stats, output == input
    y_analysis = op(x)
    jax.block_until_ready(y_analysis)
    assert jnp.array_equal(y_analysis, x)
    assert jnp.allclose(op.enc_min, jnp.min(x))
    assert jnp.allclose(op.enc_max, jnp.max(x))

    # ACTIVE: quantize-dequantize with the collected encoding
    op.set_mode(ACTIVE)
    y_active = op(x)
    jax.block_until_ready(y_active)

    # pure-JAX reference with identical math
    delta, offset, num_steps = op._compute_encoding()
    t = x * (1.0 / delta)
    q = jnp.where(t >= 0.0, jnp.floor(t + 0.5), jnp.ceil(t - 0.5))
    q = jnp.clip(q, offset, offset + num_steps)
    ref = q * delta
    assert jnp.allclose(y_active, ref, atol=1e-6, rtol=0)
    # qdq error bounded by ~half a quantization step
    assert float(jnp.max(jnp.abs(y_active - x))) <= float(delta) * 0.5 + 1e-4

    # PASSTHROUGH
    op.set_mode(PASSTHROUGH)
    y_pass = op(x)
    jax.block_until_ready(y_pass)
    assert jnp.array_equal(y_pass, x)

    print("KERNEL_OK")
</pallas_src>

<mosaic_0001>
module attributes {stable_mosaic.version = 11 : i64} {
  func.func @kernel(%arg0: i32, %arg1: i32, %arg2: memref<16x128xf32, #tpu.memory_space<vmem>>, %arg3: memref<1x1xf32, #tpu.memory_space<smem>>, %arg4: memref<1x1xf32, #tpu.memory_space<smem>>, %arg5: memref<16x128xf32, #tpu.memory_space<vmem>>, %arg6: memref<16x128xf32, #tpu.memory_space<vmem>>) attributes {dimension_semantics = [#tpu.dimension_semantics<parallel>, #tpu.dimension_semantics<arbitrary>], iteration_bounds = array<i64: 1, 1>, scalar_prefetch = 0 : i64, scratch_operands = 2 : i64, tpu.core_type = #tpu.core_type<tc>, window_params = [{transform_indices = @transform_0, window_bounds = array<i64: 16, 128>}, {transform_indices = @transform_1, window_bounds = array<i64: 1, 1>}, {transform_indices = @transform_2, window_bounds = array<i64: 1, 1>}]} {
    %c0_i32 = arith.constant 0 : i32
    %0 = arith.cmpi eq, %arg1, %c0_i32 : i32
    %1 = arith.extui %0 : i1 to i32
    %c0_i32_0 = arith.constant 0 : i32
    %2 = arith.cmpi ne, %1, %c0_i32_0 : i32
    scf.if %2 {
      %cst = arith.constant 0x7F800000 : f32
      %13 = vector.broadcast %cst : f32 to vector<16x128xf32>
      %c0_12 = arith.constant 0 : index
      %c0_13 = arith.constant 0 : index
      %14 = vector.load %arg5[%c0_12, %c0_13] : memref<16x128xf32, #tpu.memory_space<vmem>>, vector<16x128xf32>
      tpu.vector_store %arg5[%c0_12, %c0_13], %13 {strides = array<i32>} : memref<16x128xf32, #tpu.memory_space<vmem>>, vector<16x128xf32>,
      %cst_14 = arith.constant 0xFF800000 : f32
      %15 = vector.broadcast %cst_14 : f32 to vector<16x128xf32>
      %c0_15 = arith.constant 0 : index
      %c0_16 = arith.constant 0 : index
      %16 = vector.load %arg6[%c0_15, %c0_16] : memref<16x128xf32, #tpu.memory_space<vmem>>, vector<16x128xf32>
      tpu.vector_store %arg6[%c0_15, %c0_16], %15 {strides = array<i32>} : memref<16x128xf32, #tpu.memory_space<vmem>>, vector<16x128xf32>,
    } else {
    }
    %c0 = arith.constant 0 : index
    %c0_1 = arith.constant 0 : index
    %3 = vector.load %arg2[%c0, %c0_1] : memref<16x128xf32, #tpu.memory_space<vmem>>, vector<16x128xf32>
    %c0_2 = arith.constant 0 : index
    %c0_3 = arith.constant 0 : index
    %4 = vector.load %arg5[%c0_2, %c0_3] : memref<16x128xf32, #tpu.memory_space<vmem>>, vector<16x128xf32>
    %5 = arith.minimumf %4, %3 : vector<16x128xf32>
    %c0_4 = arith.constant 0 : index
    %c0_5 = arith.constant 0 : index
    %6 = vector.load %arg5[%c0_4, %c0_5] : memref<16x128xf32, #tpu.memory_space<vmem>>, vector<16x128xf32>
    tpu.vector_store %arg5[%c0_4, %c0_5], %5 {strides = array<i32>} : memref<16x128xf32, #tpu.memory_space<vmem>>, vector<16x128xf32>,
    %c0_6 = arith.constant 0 : index
    %c0_7 = arith.constant 0 : index
    %7 = vector.load %arg6[%c0_6, %c0_7] : memref<16x128xf32, #tpu.memory_space<vmem>>, vector<16x128xf32>
    %8 = arith.maximumf %7, %3 : vector<16x128xf32>
    %c0_8 = arith.constant 0 : index
    %c0_9 = arith.constant 0 : index
    %9 = vector.load %arg6[%c0_8, %c0_9] : memref<16x128xf32, #tpu.memory_space<vmem>>, vector<16x128xf32>
    tpu.vector_store %arg6[%c0_8, %c0_9], %8 {strides = array<i32>} : memref<16x128xf32, #tpu.memory_space<vmem>>, vector<16x128xf32>,
    %c0_i32_10 = arith.constant 0 : i32
    %10 = arith.cmpi eq, %arg1, %c0_i32_10 : i32
    %11 = arith.extui %10 : i1 to i32
    %c0_i32_11 = arith.constant 0 : i32
    %12 = arith.cmpi ne, %11, %c0_i32_11 : i32
    scf.if %12 {
      %c0_12 = arith.constant 0 : index
      %c0_13 = arith.constant 0 : index
      %13 = vector.load %arg5[%c0_12, %c0_13] : memref<16x128xf32, #tpu.memory_space<vmem>>, vector<16x128xf32>
      %14 = vector.shape_cast %13 : vector<16x128xf32> to vector<1x16x128xf32>
      %cst = arith.constant dense<0x7F800000> : vector<1xf32>
      %15 = vector.multi_reduction <minimumf>, %14, %cst [1, 2] : vector<1x16x128xf32> to vector<1xf32>
      %16 = vector.shape_cast %15 : vector<1xf32> to vector<1x1x1xf32>
      %17 = vector.extract %16[0, 0, 0] : f32 from vector<1x1x1xf32>
      %c0_14 = arith.constant 0 : index
      %c0_15 = arith.constant 0 : index
      %18 = memref.load %arg3[%c0_14, %c0_15] : memref<1x1xf32, #tpu.memory_space<smem>>
      memref.store %17, %arg3[%c0_14, %c0_15] : memref<1x1xf32, #tpu.memory_space<smem>>
      %c0_16 = arith.constant 0 : index
      %c0_17 = arith.constant 0 : index
      %19 = vector.load %arg6[%c0_16, %c0_17] : memref<16x128xf32, #tpu.memory_space<vmem>>, vector<16x128xf32>
      %20 = vector.shape_cast %19 : vector<16x128xf32> to vector<1x16x128xf32>
      %cst_18 = arith.constant dense<0xFF800000> : vector<1xf32>
      %21 = vector.multi_reduction <maximumf>, %20, %cst_18 [1, 2] : vector<1x16x128xf32> to vector<1xf32>
      %22 = vector.shape_cast %21 : vector<1xf32> to vector<1x1x1xf32>
      %23 = vector.extract %22[0, 0, 0] : f32 from vector<1x1x1xf32>
      %c0_19 = arith.constant 0 : index
      %c0_20 = arith.constant 0 : index
      %24 = memref.load %arg4[%c0_19, %c0_20] : memref<1x1xf32, #tpu.memory_space<smem>>
      memref.store %23, %arg4[%c0_19, %c0_20] : memref<1x1xf32, #tpu.memory_space<smem>>
    } else {
    }
    return
  }
  func.func @transform_0(%arg0: i32, %arg1: i32) -> (i32, i32) {
    %c1_i32 = arith.constant 1 : i32
    %0 = arith.muli %arg0, %c1_i32 : i32
    %1 = arith.addi %0, %arg1 : i32
    %c0_i32 = arith.constant 0 : i32
    %c0_i32_0 = arith.constant 0 : i32
    return %1, %c0_i32 : i32, i32
  }
  func.func @transform_1(%arg0: i32, %arg1: i32) -> (i32, i32) {
    %c0_i32 = arith.constant 0 : i32
    %c0_i32_0 = arith.constant 0 : i32
    return %arg0, %c0_i32 : i32, i32
  }
  func.func @transform_2(%arg0: i32, %arg1: i32) -> (i32, i32) {
    %c0_i32 = arith.constant 0 : i32
    %c0_i32_0 = arith.constant 0 : i32
    return %arg0, %c0_i32 : i32, i32
  }
}

</mosaic_0001>

<bundles_post_ra>
// kernel: tpu_custom_call.1
= control target key start
LH: loop header
LB: loop body
LE: loop exit
PB: predicated region body
PF: predicated region fallthrough
CT: control target
= control target key end

     0   :  { %8 = vsyncpa [#allocation5], 0  ;;  %s209_s0 = inlined_call_operand.hbm [shape: f32[16,128], index: 0, kind: input, shape index: {}]   ;;  %s210_s1 = inlined_call_operand.hbm [shape: f32[1,1], index: 1, kind: output, shape index: {0}]   ;;  %s211_s2 = inlined_call_operand.hbm [shape: f32[1,1], index: 2, kind: output, shape index: {1}]  }
   0x1   :  { %9 = vsyncpa [#allocation6], 0 }
   0x2   :  { %10 = vsyncpa [#allocation9], 0  ;;  %s19_s11 = sshll.u32 %s209_s0, 4  ;;  %s180_s12 = smov [#allocation4]   ;;  %s20_s11 = int_to_ptr.hbm [resolvable:$true] %s19_s11 }
   0x3   :  { %s21_s13 = sshll.u32 %s180_s12, 4  ;;  %s181_s14 = smov 128   ;;  %s22_s13 = int_to_ptr.vmem [resolvable:$true] %s21_s13 }
   0x4   :  { %s182_s15 = smov 8  }
   0x5   :  { %27 = dma.hbm_to_vmem [thread:$0]  %s20_s11, 256, %s22_s13, [#allocation5], %s181_s14, %s181_s14, %s182_s15  }
   0x6   :  { %174 = dma.done.wait [#allocation5], 256  }
   0x7   :  { %175 = vsyncadd [#allocation5], 4294967040  ;;  %v42_v0 = vld [vmem:[#allocation4] sm:$0xff]  ;;  %v43_v1 = vld [vmem:[#allocation4 + $0x8] sm:$0xff]  ;;  %s92_s17 = sshll.u32 %s210_s1, 4  ;;  %s183_s19 = smov [#allocation7]   ;;  %s93_s17 = int_to_ptr.hbm [resolvable:$true] %s92_s17 }
   0x8   :  { %v61_v2 = vmin.f32 %v42_v0, %v43_v1  ;;  %v75_v3 = vmax.f32 %v42_v0, %v43_v1  ;;  %s101_s22 = sshll.u32 %s211_s2, 4  ;;  %s184_s24 = smov [#allocation8]   ;;  %s102_s22 = int_to_ptr.hbm [resolvable:$true] %s101_s22 }
   0xa   :  { %62 = vmin.xlane.f32.xlu0 %v61_v2 }
  0x12   :  { %76 = vmax.xlane.f32.xlu0 %v75_v3 }
  0x7d   :  { %v63_v4 = vpop.xlane.xlu0 %62 }
  0x7e   :  { %v64_v5 = vrot.slane %v63_v4, 4 }
  0x80   :  { %v65_v6 = vmin.f32 %v63_v4, %v64_v5 }
  0x82   :  { %v66_v7 = vrot.slane %v65_v6, 2 }
  0x84   :  { %v67_v8 = vmin.f32 %v65_v6, %v66_v7 }
  0x85   :  { %v77_v9 = vpop.xlane.xlu0 %76 }
  0x86   :  { %v78_v10 = vrot.slane %v77_v9, 4  ;;  %v68_v11 = vrot.slane %v67_v8, 1 }
  0x88   :  { %v79_v12 = vmax.f32 %v77_v9, %v78_v10  ;;  %v69_v13 = vmin.f32 %v67_v8, %v68_v11 }
  0x8a   :  { %v80_v14 = vrot.slane %v79_v12, 2  ;;  %117 = vpush %v69_v13 }
  0x8c   :  { %v81_v15 = vmax.f32 %v79_v12, %v80_v14 }
  0x8e   :  { %v82_v16 = vrot.slane %v81_v15, 1 }
  0x90   :  { %v83_v17 = vmax.f32 %v81_v15, %v82_v16 }
  0x92   :  { %119 = vpush %v83_v17 }
  0xbb   :  { %s118_s18 = spop %117 }
  0xbc   :  { %72 = sst [smem:[#allocation7]] %s118_s18 }
  0xbd   :  { %95 = dma.smem_to_hbm %s183_s19, 16, %s93_s17, [#allocation6]  }
  0xc3   :  { %s120_s23 = spop %119 }
  0xc4   :  { %86 = sst [smem:[#allocation8]] %s120_s23 }
  0xc5   :  { %104 = dma.smem_to_hbm %s184_s24, 16, %s102_s22, [#allocation9]  }
  0xc6   :  { %176 = dma.done.wait [#allocation6], 16  }
  0xc7   :  { %177 = vsyncadd [#allocation6], 4294967280 }
  0xc8   :  { %178 = dma.done.wait [#allocation9], 16  }
  0xc9   :  { %179 = vsyncadd [#allocation9], 4294967280 }
  0xca   :  { %113 = sfence }
  0xcb   :  { %114 = vsyncpa [#allocation5], 1 }
  0xcc   :  { %115 = vsyncpa [#allocation6], 1 }
  0xcd   :  { %116 = vsyncpa [#allocation9], 1 }

</bundles_post_ra>
